<compile_context>
chip_gen: v6e
topology: v6e:2x2x1
jax: 0.10.0
libtpu: 0.0.40
codegen_flags: <defaults>
</compile_context>

<pallas_src>
import jax
import jax.numpy as jnp
from jax.experimental import pallas as pl
from jax.experimental.pallas import tpu as pltpu


def _round_up(x, m):
    return ((x + m - 1) // m) * m


def _flat_onehot(idx, f, d_max):
    """(TN, F) int32 -> (TN, F*D_max) bool; row t has a 1 at column g*D_max + idx[t, g]."""
    tn = idx.shape[0]
    offsets = jax.lax.broadcasted_iota(jnp.int32, (tn, f), 1) * d_max
    # Out-of-range indices map to a sentinel column that never matches -> zero embedding.
    oob = jnp.logical_or(idx < 0, idx >= d_max)
    flat = jnp.where(oob, f * d_max, idx + offsets)                     # (TN, F)
    col = jax.lax.broadcasted_iota(jnp.int32, (tn, f * d_max), 1)       # (TN, F*D_max)
    oh = col == flat[:, 0:1]
    for g in range(1, f):                                               # static unroll; F is small
        oh = jnp.logical_or(oh, col == flat[:, g:g + 1])
    return oh


def _make_sum_kernel(f, d_max):
    def kernel(idx_ref, tab_ref, out_ref):
        # idx_ref: (TN, F) int32 ; tab_ref: (F*D_max, d_out) VMEM-resident ; out_ref: (TN, d_out)
        oh = _flat_onehot(idx_ref[...], f, d_max).astype(tab_ref.dtype)
        out_ref[...] = jnp.dot(
            oh, tab_ref[...], preferred_element_type=jnp.float32).astype(out_ref.dtype)
    return kernel


def _make_concat_kernel(f, d_max, d_out):
    def kernel(idx_ref, tab_ref, out_ref, bd_ref):
        # Build the block-diagonal table (F*D_max, F*d_out) in VMEM scratch.  Rebuilt every
        # grid step (cheap, VMEM-only) so the kernel stays correct if the parallel N axis is
        # split across TensorCores (each core's scratch starts uninitialized).
        bd_ref[...] = jnp.zeros_like(bd_ref)
        for g in range(f):
            blk = tab_ref[g * d_max:(g + 1) * d_max, :]                 # (D_max, d_out)
            bd_ref[g * d_max:(g + 1) * d_max, g * d_out:(g + 1) * d_out] = blk
        oh = _flat_onehot(idx_ref[...], f, d_max).astype(bd_ref.dtype)
        # One big matmul (K = F*D_max, N = F*d_out) + one lane-dense store of the final slab.
        out_ref[...] = jnp.dot(
            oh, bd_ref[...], preferred_element_type=jnp.float32).astype(out_ref.dtype)
    return kernel


def multi_embedding_forward(indices, tables, aggr="concat", *, row_tile=None):
    """indices: (N, F) integer ; tables: (F, D_max, d_out) float (row-padded at init)."""
    n, f = indices.shape
    f_tab, d_max, d_out = tables.shape
    assert f_tab == f, "one embedding table per input column"
    assert d_max % 8 == 0, "pad table height to a multiple of 8 at init"

    # Generation-aware VMEM budget (v7x: 64 MiB, v5e/v6e: 128 MiB).
    try:
        vmem_cap = int(pltpu.get_tpu_info().vmem_capacity_bytes)
    except Exception:
        vmem_cap = 64 * 1024 * 1024
    vmem_limit = int(min(max(vmem_cap - 16 * 2**20, 32 * 2**20), 96 * 2**20))

    itemsize = tables.dtype.itemsize
    out_cols = f * d_out if aggr == "concat" else d_out
    tab_bytes = f * d_max * d_out * itemsize
    bd_bytes = (f * d_max) * (f * d_out) * itemsize if aggr == "concat" else 0
    if tab_bytes + bd_bytes > vmem_limit // 4:
        # TODO(synk): gather-based fallback (PrefetchScalarGridSpec row DMA) for big tables.
        raise NotImplementedError("embedding tables too large for the VMEM-resident path")

    if row_tile is None:
        # Largest row tile whose per-tile working set (double-buffered out + one-hot + idx,
        # with slack) fits in half the VMEM budget left after the resident tables.
        per_row = itemsize * 2 * out_cols + 4 * (2 * f * d_max + 4 * f)
        budget = vmem_limit // 2 - (tab_bytes + bd_bytes)
        row_tile = max(64, min(1024, budget // max(per_row, 1)))
    tn = min(_round_up(n, 8), _round_up(int(row_tile), 8))
    num_n = pl.cdiv(n, tn)
    n_pad = num_n * tn

    idx = indices.astype(jnp.int32)
    if n_pad != n:
        # Only the (tiny) index array is padded; the output keeps its exact shape and the
        # tail rows of the last block are masked by Pallas on store (no wrapper slice).
        idx = jnp.pad(idx, ((0, n_pad - n), (0, 0)))
    tab_flat = tables.reshape(f * d_max, d_out)   # free reshape; no per-call table padding

    common = dict(
        grid=(num_n,),
        in_specs=[
            pl.BlockSpec((tn, f), lambda ni: (ni, 0)),
            pl.BlockSpec((f * d_max, d_out), lambda ni: (0, 0)),   # resident: loaded once
        ],
        compiler_params=pltpu.CompilerParams(
            dimension_semantics=("parallel",),
            vmem_limit_bytes=vmem_limit),
    )

    if aggr == "concat":
        return pl.pallas_call(
            _make_concat_kernel(f, d_max, d_out),
            out_shape=jax.ShapeDtypeStruct((n, f * d_out), tables.dtype),
            out_specs=pl.BlockSpec((tn, f * d_out), lambda ni: (ni, 0)),
            scratch_shapes=[pltpu.VMEM((f * d_max, f * d_out), tables.dtype)],
            **common,
        )(idx, tab_flat)
    elif aggr == "sum":
        return pl.pallas_call(
            _make_sum_kernel(f, d_max),
            out_shape=jax.ShapeDtypeStruct((n, d_out), tables.dtype),
            out_specs=pl.BlockSpec((tn, d_out), lambda ni: (ni, 0)),
            **common,
        )(idx, tab_flat)
    else:
        raise NotImplementedError(
            "multi embedding aggregation {} is not currently supported.".format(aggr))


def init_embedding_tables(key, d_in, d_out, d_max, init=None):
    """Parameter init mirroring nn.Embedding + xavier_uniform_ / zeros; rows padded to D_max."""
    tables = []
    for di in d_in:
        key, sub = jax.random.split(key)
        if init == "zeros":
            w = jnp.zeros((di, d_out), jnp.float32)
        else:
            bound = (6.0 / (di + d_out)) ** 0.5
            w = jax.random.uniform(sub, (di, d_out), jnp.float32, -bound, bound)
        w = jnp.pad(w, ((0, d_max - di), (0, 0)))   # zero-pad rows (never indexed by valid data)
        tables.append(w)
    return jnp.stack(tables, axis=0)                # (F, D_max, d_out)


if __name__ == "__main__":
    # Small deterministic example. F=5 features, N deliberately NOT a multiple of 8 so the
    # masked-output-tail path (no padded-output slice) is exercised.
    d_in = [7, 5, 11, 4, 9]   # vocab size per input column
    d_out = 32                # embedding dim
    n = 20                    # batch of rows
    f = len(d_in)
    d_max = 16                # padded table height (>= max(d_in), multiple of 8)

    key = jax.random.PRNGKey(0)
    key, k_tab, k_idx = jax.random.split(key, 3)
    tables = init_embedding_tables(k_tab, d_in, d_out, d_max)

    cols = []
    for di in d_in:
        k_idx, sub = jax.random.split(k_idx)
        cols.append(jax.random.randint(sub, (n,), 0, di, dtype=jnp.int32))
    indices = jnp.stack(cols, axis=1)               # (N, F)

    out_concat = jax.block_until_ready(multi_embedding_forward(indices, tables, aggr="concat"))
    out_sum = jax.block_until_ready(multi_embedding_forward(indices, tables, aggr="sum"))
    assert out_concat.shape == (n, f * d_out)
    assert out_sum.shape == (n, d_out)

    # pure-JAX reference (gather per column, concat / sum)
    ref_embs = [tables[i][indices[:, i]] for i in range(f)]
    ref_concat = jnp.concatenate(ref_embs, axis=1)
    ref_sum = ref_embs[0]
    for e in ref_embs[1:]:
        ref_sum = ref_sum + e

    assert jnp.allclose(out_concat, ref_concat, atol=1e-5), "concat mismatch"
    assert jnp.allclose(out_sum, ref_sum, atol=1e-5), "sum mismatch"
    print("KERNEL_OK")
</pallas_src>

<mosaic_0001>
module attributes {stable_mosaic.version = 11 : i64} {
  func.func @kernel(%arg0: i32, %arg1: memref<24x5xi32, #tpu.memory_space<vmem>>, %arg2: memref<80x32xf32, #tpu.memory_space<vmem>>, %arg3: memref<24x160xf32, #tpu.memory_space<vmem>>, %arg4: memref<80x160xf32, #tpu.memory_space<vmem>>) attributes {dimension_semantics = [#tpu.dimension_semantics<parallel>], iteration_bounds = array<i64: 1>, scalar_prefetch = 0 : i64, scratch_operands = 1 : i64, tpu.core_type = #tpu.core_type<tc>, window_params = [{transform_indices = @transform_0, window_bounds = array<i64: 24, 5>}, {pipeline_mode = #tpu.pipeline_mode<synchronous>, transform_indices = @transform_1, window_bounds = array<i64: 80, 32>}, {transform_indices = @transform_2, window_bounds = array<i64: 24, 160>}]} {
    %cst = arith.constant 0.000000e+00 : f32
    %0 = vector.broadcast %cst : f32 to vector<80x160xf32>
    %c0 = arith.constant 0 : index
    %c0_0 = arith.constant 0 : index
    %1 = vector.load %arg4[%c0, %c0_0] : memref<80x160xf32, #tpu.memory_space<vmem>>, vector<80x160xf32>
    tpu.vector_store %arg4[%c0, %c0_0], %0 {strides = array<i32>} : memref<80x160xf32, #tpu.memory_space<vmem>>, vector<80x160xf32>,
    %c0_1 = arith.constant 0 : index
    %c0_2 = arith.constant 0 : index
    %2 = vector.load %arg2[%c0_1, %c0_2] : memref<80x32xf32, #tpu.memory_space<vmem>>, vector<16x32xf32>
    %c0_3 = arith.constant 0 : index
    %c0_4 = arith.constant 0 : index
    %3 = vector.load %arg4[%c0_3, %c0_4] : memref<80x160xf32, #tpu.memory_space<vmem>>, vector<16x32xf32>
    tpu.vector_store %arg4[%c0_3, %c0_4], %2 {strides = array<i32>} : memref<80x160xf32, #tpu.memory_space<vmem>>, vector<16x32xf32>,
    %c16 = arith.constant 16 : index
    %c0_5 = arith.constant 0 : index
    %4 = vector.load %arg2[%c16, %c0_5] : memref<80x32xf32, #tpu.memory_space<vmem>>, vector<16x32xf32>
    %c16_6 = arith.constant 16 : index
    %c32 = arith.constant 32 : index
    %5 = vector.load %arg4[%c16_6, %c32] : memref<80x160xf32, #tpu.memory_space<vmem>>, vector<16x32xf32>
    tpu.vector_store %arg4[%c16_6, %c32], %4 {strides = array<i32>} : memref<80x160xf32, #tpu.memory_space<vmem>>, vector<16x32xf32>,
    %c32_7 = arith.constant 32 : index
    %c0_8 = arith.constant 0 : index
    %6 = vector.load %arg2[%c32_7, %c0_8] : memref<80x32xf32, #tpu.memory_space<vmem>>, vector<16x32xf32>
    %c32_9 = arith.constant 32 : index
    %c64 = arith.constant 64 : index
    %7 = vector.load %arg4[%c32_9, %c64] : memref<80x160xf32, #tpu.memory_space<vmem>>, vector<16x32xf32>
    tpu.vector_store %arg4[%c32_9, %c64], %6 {strides = array<i32>} : memref<80x160xf32, #tpu.memory_space<vmem>>, vector<16x32xf32>,
    %c48 = arith.constant 48 : index
    %c0_10 = arith.constant 0 : index
    %8 = vector.load %arg2[%c48, %c0_10] : memref<80x32xf32, #tpu.memory_space<vmem>>, vector<16x32xf32>
    %c48_11 = arith.constant 48 : index
    %c96 = arith.constant 96 : index
    %9 = vector.load %arg4[%c48_11, %c96] : memref<80x160xf32, #tpu.memory_space<vmem>>, vector<16x32xf32>
    tpu.vector_store %arg4[%c48_11, %c96], %8 {strides = array<i32>} : memref<80x160xf32, #tpu.memory_space<vmem>>, vector<16x32xf32>,
    %c64_12 = arith.constant 64 : index
    %c0_13 = arith.constant 0 : index
    %10 = vector.load %arg2[%c64_12, %c0_13] : memref<80x32xf32, #tpu.memory_space<vmem>>, vector<16x32xf32>
    %c64_14 = arith.constant 64 : index
    %c128 = arith.constant 128 : index
    %11 = vector.load %arg4[%c64_14, %c128] : memref<80x160xf32, #tpu.memory_space<vmem>>, vector<16x32xf32>
    tpu.vector_store %arg4[%c64_14, %c128], %10 {strides = array<i32>} : memref<80x160xf32, #tpu.memory_space<vmem>>, vector<16x32xf32>,
    %c0_15 = arith.constant 0 : index
    %c0_16 = arith.constant 0 : index
    %12 = vector.load %arg1[%c0_15, %c0_16] : memref<24x5xi32, #tpu.memory_space<vmem>>, vector<24x5xi32>
    %13 = tpu.iota {dimensions = array<i32: 1>} : vector<24x5xi32>
    %c16_i32 = arith.constant 16 : i32
    %14 = vector.broadcast %c16_i32 : i32 to vector<24x5xi32>
    %15 = arith.muli %13, %14 : vector<24x5xi32>
    %c0_i32 = arith.constant 0 : i32
    %16 = vector.broadcast %c0_i32 : i32 to vector<24x5xi32>
    %17 = arith.cmpi slt, %12, %16 : vector<24x5xi32>
    %c16_i32_17 = arith.constant 16 : i32
    %18 = vector.broadcast %c16_i32_17 : i32 to vector<24x5xi32>
    %19 = arith.cmpi sge, %12, %18 : vector<24x5xi32>
    %20 = arith.ori %17, %19 : vector<24x5xi1>
    %21 = arith.addi %12, %15 : vector<24x5xi32>
    %c80_i32 = arith.constant 80 : i32
    %22 = vector.broadcast %c80_i32 : i32 to vector<24x5xi32>
    %23 = arith.select %20, %22, %21 : vector<24x5xi1>, vector<24x5xi32>
    %24 = tpu.iota {dimensions = array<i32: 1>} : vector<24x80xi32>
    %25 = vector.extract_strided_slice %23 {offsets = [0, 0], sizes = [24, 1], strides = [1, 1]} : vector<24x5xi32> to vector<24x1xi32>
    %26 = vector.broadcast %25 : vector<24x1xi32> to vector<24x80xi32>
    %27 = arith.cmpi eq, %24, %26 : vector<24x80xi32>
    %28 = vector.extract_strided_slice %23 {offsets = [0, 1], sizes = [24, 1], strides = [1, 1]} : vector<24x5xi32> to vector<24x1xi32>
    %29 = vector.broadcast %28 : vector<24x1xi32> to vector<24x80xi32>
    %30 = arith.cmpi eq, %24, %29 : vector<24x80xi32>
    %31 = arith.ori %27, %30 : vector<24x80xi1>
    %32 = vector.extract_strided_slice %23 {offsets = [0, 2], sizes = [24, 1], strides = [1, 1]} : vector<24x5xi32> to vector<24x1xi32>
    %33 = vector.broadcast %32 : vector<24x1xi32> to vector<24x80xi32>
    %34 = arith.cmpi eq, %24, %33 : vector<24x80xi32>
    %35 = arith.ori %31, %34 : vector<24x80xi1>
    %36 = vector.extract_strided_slice %23 {offsets = [0, 3], sizes = [24, 1], strides = [1, 1]} : vector<24x5xi32> to vector<24x1xi32>
    %37 = vector.broadcast %36 : vector<24x1xi32> to vector<24x80xi32>
    %38 = arith.cmpi eq, %24, %37 : vector<24x80xi32>
    %39 = arith.ori %35, %38 : vector<24x80xi1>
    %40 = vector.extract_strided_slice %23 {offsets = [0, 4], sizes = [24, 1], strides = [1, 1]} : vector<24x5xi32> to vector<24x1xi32>
    %41 = vector.broadcast %40 : vector<24x1xi32> to vector<24x80xi32>
    %42 = arith.cmpi eq, %24, %41 : vector<24x80xi32>
    %43 = arith.ori %39, %42 : vector<24x80xi1>
    %44 = arith.extui %43 : vector<24x80xi1> to vector<24x80xi32>
    %45 = arith.sitofp %44 : vector<24x80xi32> to vector<24x80xf32>
    %c0_18 = arith.constant 0 : index
    %c0_19 = arith.constant 0 : index
    %46 = vector.load %arg4[%c0_18, %c0_19] : memref<80x160xf32, #tpu.memory_space<vmem>>, vector<80x160xf32>
    %cst_20 = arith.constant dense<0.000000e+00> : vector<24x160xf32>
    %47 = tpu.matmul %45, %46, %cst_20 {dimension_numbers = #tpu.dot_dimension_numbers<[1], [0], [0], [1], [0, 0, 1, 1], [], []>} : vector<24x80xf32>, vector<80x160xf32>, vector<24x160xf32> -> vector<24x160xf32>
    %c0_21 = arith.constant 0 : index
    %c0_22 = arith.constant 0 : index
    %48 = vector.load %arg3[%c0_21, %c0_22] : memref<24x160xf32, #tpu.memory_space<vmem>>, vector<24x160xf32>
    tpu.vector_store %arg3[%c0_21, %c0_22], %47 {strides = array<i32>} : memref<24x160xf32, #tpu.memory_space<vmem>>, vector<24x160xf32>,
    return
  }
  func.func @transform_0(%arg0: i32) -> (i32, i32) {
    %c0_i32 = arith.constant 0 : i32
    %c0_i32_0 = arith.constant 0 : i32
    return %arg0, %c0_i32 : i32, i32
  }
  func.func @transform_1(%arg0: i32) -> (i32, i32) {
    %c0_i32 = arith.constant 0 : i32
    %c0_i32_0 = arith.constant 0 : i32
    %c0_i32_1 = arith.constant 0 : i32
    return %c0_i32, %c0_i32_0 : i32, i32
  }
  func.func @transform_2(%arg0: i32) -> (i32, i32) {
    %c0_i32 = arith.constant 0 : i32
    %c0_i32_0 = arith.constant 0 : i32
    return %arg0, %c0_i32 : i32, i32
  }
}

</mosaic_0001>

<bundles_post_ra>
// kernel: tpu_custom_call.1
= control target key start
LH: loop header
LB: loop body
LE: loop exit
PB: predicated region body
PF: predicated region fallthrough
CT: control target
= control target key end

     0   :  { %v83_v2 = vlaneseq  ;;  %s386_s13 = smov 96   ;;  %s387_s14 = smov 64   ;;  %v388_v5 = vmov 1   ;;  %v389_v6 = vmov 0   ;;  %v390_v13 = vmov 0.0   ;;  %s533_s0 = inlined_call_operand.vmem [shape: s32[24,5], index: 0, kind: input, shape index: {}]   ;;  %s534_s1 = inlined_call_operand.vmem [shape: f32[80,32], index: 1, kind: input, shape index: {}]   ;;  %s535_s2 = inlined_call_operand.hbm [shape: f32[20,160], index: 2, kind: output, shape index: {}]  }
   0x1   :  { %v64_v0 = vld [vmem:[%s534_s1 + $0x38] sm:$0xff]  ;;  %v51_v1 = vld [vmem:[%s534_s1 + $0x28] sm:$0xff]  ;;  %v63_v3 = vld [vmem:[%s534_s1 + $0x30] sm:$0xff]  ;;  %353 = vset.pattern.permute.xlu1 %v388_v5  ;;  %352 = vset.pattern.permute.xlu0 %v389_v6  ;;  %27 = vst [vmem:[#allocation2 + $0x70] sm:$0xff] %v390_v13  ;;  %vm13_vm2 = vcmask 261120  }
   0x2   :  { %69 = vrot.lane.b32.xlu0 %v64_v0, %s386_s13  ;;  %56 = vrot.lane.b32.xlu1 %v51_v1, %s387_s14  ;;  %v50_v4 = vld [vmem:[%s534_s1 + $0x20] sm:$0xff]  ;;  %v81_v7 = vld [vmem:[%s533_s0 + $0x8] sm:$0xff]  ;;  %v430_v8 = vand.u32 127, %v83_v2  ;;  %12 = vst [vmem:[#allocation2] sm:$0xff] %v390_v13  ;;  %15 = vst [vmem:[#allocation2 + $0x10] sm:$0xff] %v390_v13 }
   0x3   :  { %vm87_vm0 = vcmp.lt.s32.totalorder %v81_v7, 0  ;;  %vm90_vm1 = vcmp.ge.s32.totalorder %v81_v7, 16  ;;  %v77_v10 = vld [vmem:[%s534_s1 + $0x48] sm:$0xff]  ;;  %v76_v11 = vld [vmem:[%s534_s1 + $0x40] sm:$0xff]  ;;  %v82_v12 = vld [vmem:[%s533_s0 + $0x10] sm:$0xff]  ;;  %17 = vst [vmem:[#allocation2 + $0x20] sm:$0xff] %v390_v13  ;;  %279 = vmatprep.mubr.f32.mxu1 %v390_v13  ;;  %273 = vmatprep.mubr.f32.mxu0 %v390_v13 }
   0x4   :  { %v85_v9 = vmul.u32 16, %v430_v8  ;;  %19 = vst [vmem:[#allocation2 + $0x30] sm:$0xff] %v390_v13  ;;  %21 = vst [vmem:[#allocation2 + $0x40] sm:$0xff] %v390_v13  ;;  %v38_v14 = vld [vmem:[%s534_s1 + $0x18] sm:$0xff]  ;;  %v37_v15 = vld [vmem:[%s534_s1 + $0x10] sm:$0xff] }
   0x5   :  { %23 = vst [vmem:[#allocation2 + $0x50] sm:$0xff] %v390_v13  ;;  %25 = vst [vmem:[#allocation2 + $0x60] sm:$0xff] %v390_v13 }
   0x6   :  { %67 = vrot.lane.b32.xlu0 %v63_v3, %s386_s13  ;;  %54 = vrot.lane.b32.xlu1 %v50_v4, %s387_s14  ;;  %vm458_vm3 = vmor %vm87_vm0, %vm90_vm1  ;;  %v96_v17 = vadd.s32 %v85_v9, %v81_v7  ;;  %32 = vst.msk [vmem:[#allocation2 + $0x98] sm:$0xff] %vm13_vm2, %v390_v13 }
   0x7   :  { %14 = vst.msk [vmem:[#allocation2 + $0x8] sm:$0xff] %vm13_vm2, %v390_v13  ;;  %16 = vst.msk [vmem:[#allocation2 + $0x18] sm:$0xff] %vm13_vm2, %v390_v13 }
   0x8   :  { %18 = vst.msk [vmem:[#allocation2 + $0x28] sm:$0xff] %vm13_vm2, %v390_v13  ;;  %20 = vst.msk [vmem:[#allocation2 + $0x38] sm:$0xff] %vm13_vm2, %v390_v13 }
   0x9   :  { %22 = vst.msk [vmem:[#allocation2 + $0x48] sm:$0xff] %vm13_vm2, %v390_v13  ;;  %24 = vst.msk [vmem:[#allocation2 + $0x58] sm:$0xff] %vm13_vm2, %v390_v13 }
   0xa   :  { %26 = vst.msk [vmem:[#allocation2 + $0x68] sm:$0xff] %vm13_vm2, %v390_v13  ;;  %28 = vst.msk [vmem:[#allocation2 + $0x78] sm:$0xff] %vm13_vm2, %v390_v13 }
   0xb   :  { %30 = vst.msk [vmem:[#allocation2 + $0x88] sm:$0xff] %vm13_vm2, %v390_v13  ;;  %79 = vst.msk [vmem:[#allocation2 + $0x98] sm:$0xff] %vm13_vm2, %v77_v10 }
   0xc   :  { %78 = vst.msk [vmem:[#allocation2 + $0x88] sm:$0xff] %vm13_vm2, %v76_v11 }
   0xd   :  { %7 = vsyncpa [#allocation4], 0  ;;  %vm88_vm4 = vcmp.lt.s32.totalorder %v82_v12, 0  ;;  %vm91_vm5 = vcmp.ge.s32.totalorder %v82_v12, 16  ;;  %s391_s3 = smov 32   ;;  %v99_v18 = vsel %vm458_vm3, 80, %v96_v17  ;;  %v97_v19 = vadd.s32 %v85_v9, %v82_v12 }
   0xe   :  { %43 = vrot.lane.b32.xlu0 %v38_v14, %s391_s3  ;;  %41 = vrot.lane.b32.xlu1 %v37_v15, %s391_s3  ;;  %v80_v20 = vld [vmem:[%s533_s0] sm:$0xff]  ;;  %vm94_vm6 = vmor %vm88_vm4, %vm91_vm5  ;;  %v34_v25 = vld [vmem:[%s534_s1 + $0x8] sm:$0xff]  ;;  %v392_v26 = vmov 2   ;;  %v393_v30 = vmov 4   ;;  %v394_v31 = vmov 3   ;;  %vm73_vm10 = vcmask 1048320  }
   0xf   :  { %vm86_vm7 = vcmp.lt.s32.totalorder %v80_v20, 0  ;;  %vm89_vm8 = vcmp.ge.s32.totalorder %v80_v20, 16  ;;  %v100_v21 = vsel %vm94_vm6, 80, %v97_v19  ;;  %v95_v23 = vadd.s32 %v85_v9, %v80_v20  ;;  %36 = vst.msk [vmem:[#allocation2 + $0x10] sm:$0xff] %vm13_vm2, %v34_v25  ;;  %v33_v28 = vld [vmem:[%s534_s1] sm:$0xff]  ;;  %v186_v44 = vld [vmem:[#allocation2 + $0x38] sm:$0xff] }
  0x10   :  { %vm92_vm9 = vmor %vm86_vm7, %vm89_vm8  ;;  %35 = vst.msk [vmem:[#allocation2] sm:$0xff] %vm13_vm2, %v33_v28  ;;  %vm60_vm11 = vcmask 785920   ;;  %vm47_vm12 = vcmask 523520   ;;  %v190_v40 = vld [vmem:[#allocation2 + $0x58] sm:$0xff]  ;;  %v188_v42 = vld [vmem:[#allocation2 + $0x48] sm:$0xff]  ;;  %vm199_vm6 = vcmask 654336  }
  0x11   :  { %v194_v27 = vld [vmem:[#allocation2 + $0x78] sm:$0xff]  ;;  %v98_v29 = vsel %vm92_vm9, 80, %v95_v23  ;;  %v192_v36 = vld [vmem:[#allocation2 + $0x68] sm:$0xff]  ;;  %s395_s1 = smov [#allocation3]  }
  0x12   :  { %105 = vperm.xlu0 %352, %v99_v18   ;;  %117 = vperm.xlu1 %353, %v99_v18   ;;  %v198_v22 = vld [vmem:[#allocation2 + $0x98] sm:$0xff]  ;;  %v184_v47 = vld [vmem:[#allocation2 + $0x28] sm:$0xff]  ;;  %s303_s9 = sshll.u32 %s395_s1, 4  ;;  %s304_s9 = int_to_ptr.vmem [resolvable:$true] %s303_s9 }
  0x13   :  { %221 = vmatprep.subr.mxu0 %v198_v22  ;;  %320 = vmatprep.subr.mxu1 %v198_v22  ;;  %v196_v24 = vld [vmem:[#allocation2 + $0x88] sm:$0xff]  ;;  %v182_v48 = vld [vmem:[#allocation2 + $0x18] sm:$0xff]  ;;  %s364_s10 = scalar_lea.vmem %s304_s9, 768  ;;  %p369_p1 = scmp.lt.s32.totalorder %s304_s9, %s304_s9 }
  0x14   :  { %222 = vmatpush1.msra.mxu0 %v390_v13  ;;  %330 = vmatpush1.msra.mxu1 %v390_v13  ;;  %v180_v53 = vld [vmem:[#allocation2 + $0x8] sm:$0xff]  ;;  %p365_p0 = scmp.ne.s32.totalorder %s304_s9, %s364_s10  ;;  %p370_p2 = scmp.lt.s32.totalorder %s364_s10, %s364_s10 }
  0x15   :  { %223 = vmatprep.subr.mxu0 %v196_v24  ;;  %321 = vmatprep.subr.mxu1 %v196_v24 }
  0x16   :  { %108 = vperm.xlu0 %352, %v100_v21   ;;  %354 = vset.pattern.permute.xlu1 %v392_v26  ;;  %v181_v50 = vld [vmem:[#allocation2 + $0x10] sm:$0xff]  ;;  %p371_p3 = por %p370_p2, %p369_p1 }
  0x17   :  { %132 = vperm.xlu1 %354, %v99_v18   ;;  %224 = vmatpush1.msra.mxu0 %v390_v13  ;;  %v179_v54 = vld [vmem:[#allocation2] sm:$0xff] }
  0x18   :  { %331 = vmatpush1.msra.mxu1 %v390_v13  ;;  %225 = vmatprep.subr.mxu0 %v194_v27  ;;  %p372_p4 = pnand %p371_p3, %p365_p0 }
  0x19   :  { %322 = vmatprep.subr.mxu1 %v194_v27 }
  0x1a   :  { %358 = vset.pattern.permute.xlu0 %v392_v26 }
  0x1b   :  { %129 = vperm.xlu0 %358, %v98_v29   ;;  %355 = vset.pattern.permute.xlu1 %v393_v30 }
  0x1c   :  { %162 = vperm.xlu1 %355, %v99_v18  }
  0x1f   :  { %359 = vset.pattern.permute.xlu0 %v394_v31 }
  0x20   :  { %147 = vperm.xlu0 %359, %v99_v18   ;;  %356 = vset.pattern.permute.xlu1 %v389_v6 }
  0x21   :  { %102 = vperm.xlu1 %356, %v98_v29  }
  0x24   :  { %150 = vperm.xlu0 %359, %v100_v21  }
  0x25   :  { %357 = vset.pattern.permute.xlu1 %v388_v5 }
  0x26   :  { %114 = vperm.xlu1 %357, %v98_v29  }
  0x28   :  { %363 = vset.pattern.permute.xlu0 %v393_v30 }
  0x2a   :  { %120 = vperm.xlu1 %357, %v100_v21  }
  0x2e   :  { %360 = vset.pattern.permute.xlu1 %v392_v26 }
  0x2f   :  { %135 = vperm.xlu1 %360, %v100_v21  }
  0x33   :  { %361 = vset.pattern.permute.xlu1 %v394_v31 }
  0x34   :  { %144 = vperm.xlu1 %361, %v98_v29  }
  0x38   :  { %362 = vset.pattern.permute.xlu1 %v393_v30 }
  0x39   :  { %159 = vperm.xlu1 %362, %v98_v29  }
  0x3d   :  { %165 = vperm.xlu1 %362, %v100_v21  }
  0x74   :  { %v70_v32 = vpop.permute.xlu0 %69  ;;  %v57_v33 = vpop.permute.xlu1 %56 }
  0x75   :  { %75 = vst.msk [vmem:[#allocation2 + $0x70] sm:$0xff] %vm73_vm10, %v70_v32 }
  0x76   :  { %62 = vst.msk [vmem:[#allocation2 + $0x50] sm:$0xff] %vm60_vm11, %v57_v33 }
  0x78   :  { %v68_v34 = vpop.permute.xlu0 %67  ;;  %v55_v35 = vpop.permute.xlu1 %54 }
  0x79   :  { %74 = vst.msk [vmem:[#allocation2 + $0x60] sm:$0xff] %vm73_vm10, %v68_v34 }
  0x7a   :  { %61 = vst.msk [vmem:[#allocation2 + $0x40] sm:$0xff] %vm60_vm11, %v55_v35 }
  0x7c   :  { %v193_v39 = vld [vmem:[#allocation2 + $0x70] sm:$0xff] }
  0x7d   :  { %226 = vmatpush1.msra.mxu0 %v193_v39  ;;  %332 = vmatpush1.msra.mxu1 %v193_v39  ;;  %v189_v43 = vld [vmem:[#allocation2 + $0x50] sm:$0xff] }
  0x7e   :  { %227 = vmatprep.subr.mxu0 %v192_v36  ;;  %323 = vmatprep.subr.mxu1 %v192_v36 }
  0x80   :  { %v42_v37 = vpop.permute.xlu1 %41  ;;  %v44_v38 = vpop.permute.xlu0 %43  ;;  %v191_v41 = vld [vmem:[#allocation2 + $0x60] sm:$0xff] }
  0x81   :  { %48 = vst.msk [vmem:[#allocation2 + $0x20] sm:$0xff] %vm47_vm12, %v42_v37  ;;  %49 = vst.msk [vmem:[#allocation2 + $0x30] sm:$0xff] %vm47_vm12, %v44_v38  ;;  %228 = vmatpush1.msra.mxu0 %v191_v41  ;;  %333 = vmatpush1.msra.mxu1 %v191_v41  ;;  %v187_v45 = vld [vmem:[#allocation2 + $0x40] sm:$0xff] }
  0x82   :  { %229 = vmatprep.subr.mxu0 %v190_v40  ;;  %324 = vmatprep.subr.mxu1 %v190_v40 }
  0x83   :  { %230 = vmatpush1.msra.mxu0 %v189_v43  ;;  %334 = vmatpush1.msra.mxu1 %v189_v43 }
  0x84   :  { %231 = vmatprep.subr.mxu0 %v188_v42  ;;  %325 = vmatprep.subr.mxu1 %v188_v42 }
  0x85   :  { %232 = vmatpush1.msra.mxu0 %v187_v45  ;;  %335 = vmatpush1.msra.mxu1 %v187_v45 }
  0x86   :  { %233 = vmatprep.subr.mxu0 %v186_v44  ;;  %326 = vmatprep.subr.mxu1 %v186_v44 }
  0x88   :  { %v185_v46 = vld [vmem:[#allocation2 + $0x30] sm:$0xff]  ;;  %v183_v49 = vld [vmem:[#allocation2 + $0x20] sm:$0xff] }
  0x89   :  { %234 = vmatpush1.msra.mxu0 %v185_v46  ;;  %336 = vmatpush1.msra.mxu1 %v185_v46 }
  0x8a   :  { %235 = vmatprep.subr.mxu0 %v184_v47  ;;  %327 = vmatprep.subr.mxu1 %v184_v47 }
  0x8b   :  { %236 = vmatpush1.msra.mxu0 %v183_v49  ;;  %337 = vmatpush1.msra.mxu1 %v183_v49 }
  0x8c   :  { %328 = vmatprep.subr.mxu1 %v182_v48  ;;  %237 = vmatprep.subr.mxu0 %v182_v48 }
  0x8d   :  { %v106_v51 = vpop.permute.xlu0 %105  ;;  %v118_v52 = vpop.permute.xlu1 %117  ;;  %338 = vmatpush1.msra.mxu1 %v181_v50  ;;  %238 = vmatpush1.msra.mxu0 %v181_v50 }
  0x8e   :  { %329 = vmatprep.subr.mxu1 %v180_v53  ;;  %239 = vmatprep.subr.mxu0 %v180_v53  ;;  %vm111_vm13 = vcmp.eq.s32.totalorder %v430_v8, %v106_v51  ;;  %vm123_vm14 = vcmp.eq.s32.totalorder %v430_v8, %v118_v52 }
  0x8f   :  { %339 = vmatpush1.msra.mxu1 %v179_v54  ;;  %240 = vmatpush1.msra.mxu0 %v179_v54  ;;  %vm126_vm0 = vmor %vm111_vm13, %vm123_vm14 }
  0x91   :  { %v109_v55 = vpop.permute.xlu0 %108 }
  0x92   :  { %v133_v56 = vpop.permute.xlu1 %132  ;;  %vm112_vm12 = vcmp.eq.s32.totalorder %v430_v8, %v109_v55 }
  0x93   :  { %vm138_vm15 = vcmp.eq.s32.totalorder %v430_v8, %v133_v56 }
  0x94   :  { %vm141_vm1 = vmor %vm126_vm0, %vm138_vm15 }
  0x96   :  { %v130_v57 = vpop.permute.xlu0 %129 }
  0x97   :  { %v163_v58 = vpop.permute.xlu1 %162  ;;  %vm137_vm10 = vcmp.eq.s32.totalorder %v430_v8, %v130_v57 }
  0x98   :  { %vm168_vm4 = vcmp.eq.s32.totalorder %v430_v8, %v163_v58 }
  0x9b   :  { %v148_v59 = vpop.permute.xlu0 %147 }
  0x9c   :  { %vm153_vm3 = vcmp.eq.s32.totalorder %v430_v8, %v148_v59  ;;  %v103_v60 = vpop.permute.xlu1 %102 }
  0x9d   :  { %vm156_vm5 = vmor %vm141_vm1, %vm153_vm3  ;;  %vm110_vm9 = vcmp.eq.s32.totalorder %v430_v8, %v103_v60 }
  0x9e   :  { %vm171_vm7 = vmor %vm156_vm5, %vm168_vm4 }
  0x9f   :  { %v315_v61 = vsel %vm171_vm7, 1.0, %v390_v13  ;;  %v151_v2 = vpop.permute.xlu0 %150 }
  0xa0   :  { %318 = vmatmul.mubr.msk.f32.vlgmr.msra.gmra.mxu1 %vm199_vm6, %v315_v61  ;;  %vm154_vm7 = vcmp.eq.s32.totalorder %v430_v8, %v151_v2 }
  0xa1   :  { %v115_v62 = vpop.permute.xlu1 %114  ;;  %285 = vmatprep.mubr.f32.mxu1 %v390_v13 }
  0xa2   :  { %vm122_vm8 = vcmp.eq.s32.totalorder %v430_v8, %v115_v62 }
  0xa3   :  { %vm125_vm11 = vmor %vm110_vm9, %vm122_vm8 }
  0xa4   :  { %vm140_vm15 = vmor %vm125_vm11, %vm137_vm10 }
  0xa5   :  { %v121_v63 = vpop.permute.xlu1 %120 }
  0xa6   :  { %vm124_vm13 = vcmp.eq.s32.totalorder %v430_v8, %v121_v63 }
  0xa7   :  { %vm127_vm1 = vmor %vm112_vm12, %vm124_vm13 }
  0xaa   :  { %v136_v0 = vpop.permute.xlu1 %135 }
  0xab   :  { %vm139_vm14 = vcmp.eq.s32.totalorder %v430_v8, %v136_v0 }
  0xac   :  { %vm142_vm3 = vmor %vm127_vm1, %vm139_vm14 }
  0xad   :  { %vm157_vm9 = vmor %vm142_vm3, %vm154_vm7 }
  0xaf   :  { %v145_v1 = vpop.permute.xlu1 %144 }
  0xb0   :  { %vm152_vm0 = vcmp.eq.s32.totalorder %v430_v8, %v145_v1 }
  0xb1   :  { %vm155_vm4 = vmor %vm140_vm15, %vm152_vm0 }
  0xb4   :  { %v160_v3 = vpop.permute.xlu1 %159 }
  0xb5   :  { %vm167_vm5 = vcmp.eq.s32.totalorder %v430_v8, %v160_v3 }
  0xb6   :  { %vm170_vm8 = vmor %vm155_vm4, %vm167_vm5 }
  0xb7   :  { %v314_v4 = vsel %vm170_vm8, 1.0, %v390_v13 }
  0xb8   :  { %v166_v5 = vpop.permute.xlu1 %165  ;;  %317 = vmatmul.mubr.msk.f32.vlgmr.msra.gmra.mxu0 %vm199_vm6, %v314_v4 }
  0xb9   :  { %vm169_vm10 = vcmp.eq.s32.totalorder %v430_v8, %v166_v5 }
  0xba   :  { %vm172_vm11 = vmor %vm157_vm9, %vm169_vm10 }
  0xbb   :  { %v316_v6 = vsel %vm172_vm11, 1.0, %v390_v13 }
  0xbc   :  { %319 = vmatmul.mubr.msk.f32.gmra.mxu1 %vm199_vm6, %v316_v6 }
 0x160   :  { %v281_v7 = vpop.f32.mrf.mxu1 }
 0x161   :  { %294 = vst [vmem:[#allocation3 + $0x10] sm:$0xff] %v281_v7 }
 0x162   :  { %v283_v9 = vpop.f32.mrf.mxu1 }
 0x163   :  { %295 = vst.msk [vmem:[#allocation3 + $0x18] sm:$0xff] %vm13_vm2, %v283_v9 }
 0x178   :  { %v275_v10 = vpop.f32.mrf.mxu0 }
 0x179   :  { %292 = vst [vmem:[#allocation3] sm:$0xff] %v275_v10 }
 0x17a   :  { %v277_v11 = vpop.f32.mrf.mxu0 }
 0x17b   :  { %293 = vst.msk [vmem:[#allocation3 + $0x8] sm:$0xff] %vm13_vm2, %v277_v11 }
 0x17c   :  { %v287_v12 = vpop.f32.mrf.mxu1 }
 0x17d   :  { %296 = vst [vmem:[#allocation3 + $0x20] sm:$0xff] %v287_v12 }
 0x17e   :  { %v289_v8 = vpop.f32.mrf.mxu1 }
 0x17f   :  { %297 = vst.msk [vmem:[#allocation3 + $0x28] sm:$0xff] %vm13_vm2, %v289_v8 }
 0x180   :  { %375 = shalt.err (!%p372_p4)
}
 0x181   :  { %s396_s11 = smov 256   ;;  %s397_s12 = smov 16  }
 0x182   :  { %309 = dma.vmem_to_hbm [thread:$0]  %s304_s9, 768, %s535_s2, [#allocation4], %s396_s11, %s396_s11, %s397_s12  }
 0x183   :  { %384 = dma.done.wait [#allocation4], 768  }
 0x184   :  { %385 = vsyncadd [#allocation4], 4294966528 }
 0x185   :  { %313 = vsyncpa [#allocation4], 1 }

</bundles_post_ra>
